<compile_context>
chip_gen: v7x
topology: tpu7x:2x2x1
jax: 0.10.0
libtpu: 0.0.40
codegen_flags: <defaults>
</compile_context>

<pallas_src>
import jax
import jax.numpy as jnp
from jax.experimental import pallas as pl
from jax.experimental.pallas import tpu as pltpu

EPS = 1e-5
LANE = 128


def _round_up(x, m):
    return ((x + m - 1) // m) * m


def _swish(h):
    # x * sigmoid(x) == 0.5 * x * (1 + tanh(x/2)) -> single EUP op, no exp overflow.
    return 0.5 * h * (1.0 + jnp.tanh(0.5 * h))


def _tpu_hw_info():
    """Returns (usable_vmem_bytes, num_tensorcores_per_chip, mxu_rows)."""
    try:
        kind = jax.devices()[0].device_kind.lower()
    except Exception:
        kind = ""
    if "v5" in kind:
        vmem_cap, num_tc, mxu_rows = 128 << 20, 1, 128
    elif "v6" in kind:
        vmem_cap, num_tc, mxu_rows = 128 << 20, 1, 256
    elif "v7" in kind:
        vmem_cap, num_tc, mxu_rows = 64 << 20, 2, 256
    else:
        vmem_cap, num_tc, mxu_rows = 64 << 20, 1, 256  # conservative default
    try:
        vmem_cap = int(pltpu.get_tpu_info().vmem_capacity_bytes)
    except Exception:
        pass
    usable = int(vmem_cap * 0.85)  # ~108 MiB on v5e/v6e, ~54 MiB on v7x
    return usable, num_tc, mxu_rows


def _make_kernel(plan, compute_dtype):
    """Fused forward kernel for a static layer plan.

    plan ops (all indices / dims are static Python ints):
      ("linear",   w_idx, bias_row, d_out_pad)
      ("instnorm", d_actual, d_pad)
      ("swish",)
      ("resblock", w1_idx, b1_row, w2_idx, b2_row, d_pad)
    """

    def kernel(x_ref, bias_ref, *refs):
        w_refs = refs[:-1]
        out_ref = refs[-1]

        def bias(row, d_pad):
            # Read at use site (static, lane-aligned slice) -> short live range.
            return bias_ref[row:row + 1, :d_pad]

        h = x_ref[...]  # bf16 tile; first op is a linear, which casts as needed
        for op in plan:
            kind = op[0]
            if kind == "linear":
                w = w_refs[op[1]][...]
                h = jnp.dot(h.astype(compute_dtype), w,
                            preferred_element_type=jnp.float32) + bias(op[2], op[3])
            elif kind == "instnorm":
                d_act = op[1]
                # Padded lanes are exactly zero here (pad weight cols and pad
                # bias lanes are zero), so sums over the padded width equal
                # sums over the real width. Single-pass var = E[h^2] - mu^2,
                # clamped at 0 to avoid NaN from catastrophic cancellation.
                inv_d = 1.0 / float(d_act)
                mu = jnp.sum(h, axis=-1, keepdims=True) * inv_d
                ex2 = jnp.sum(h * h, axis=-1, keepdims=True) * inv_d
                var = jnp.maximum(ex2 - mu * mu, 0.0)
                h = (h - mu) * jax.lax.rsqrt(var + EPS)
                # Pad lanes become -mu*rsqrt(...) != 0 here; harmless because
                # every downstream weight has zero pad rows and the final
                # output is sliced to out_dim (no later instnorm exists).
            elif kind == "swish":
                h = _swish(h)
            elif kind == "resblock":
                w1 = w_refs[op[1]][...]
                w2 = w_refs[op[3]][...]
                d_pad = op[5]
                inner = jnp.dot(h.astype(compute_dtype), w1,
                                preferred_element_type=jnp.float32) + bias(op[2], d_pad)
                inner = _swish(inner)
                inner = jnp.dot(inner.astype(compute_dtype), w2,
                                preferred_element_type=jnp.float32) + bias(op[4], d_pad)
                h = h + inner
            else:
                raise ValueError(kind)
        out_ref[...] = h.astype(out_ref.dtype)

    return kernel


def make_vector_encoder_params(key, in_dim, inner_dims, out_dim,
                               w_dtype=jnp.bfloat16):
    """Builds lane-padded bf16 weights, a packed f32 bias slab, a static kernel
    plan, and a raw-f32 reference plan (for correctness checking)."""
    weights = []   # padded (d_in_pad, d_out_pad) arrays in w_dtype
    biases = []    # raw (d_out,) f32 vectors, packed into one slab at the end
    plan = []
    ref_plan = []

    def add_linear(k, d_in, d_out):
        kw, kb = jax.random.split(k)
        bound = 1.0 / float(d_in) ** 0.5  # PyTorch nn.Linear default init
        w = jax.random.uniform(kw, (d_in, d_out), jnp.float32, -bound, bound)
        b = jax.random.uniform(kb, (d_out,), jnp.float32, -bound, bound)
        d_in_pad = _round_up(d_in, LANE)
        d_out_pad = _round_up(d_out, LANE)
        w_pad = jnp.zeros((d_in_pad, d_out_pad), jnp.float32)
        w_pad = w_pad.at[:d_in, :d_out].set(w)
        w_idx = len(weights)
        b_idx = len(biases)
        weights.append(w_pad.astype(w_dtype))
        biases.append(b)
        return w_idx, b_idx, d_out_pad, w, b

    keys = jax.random.split(key, 3 * len(inner_dims) + 1)
    ki = 0
    d_prev = in_dim
    for i, d in enumerate(inner_dims):
        w_idx, b_idx, d_pad, w, b = add_linear(keys[ki], d_prev, d)
        ki += 1
        plan.append(("linear", w_idx, b_idx, d_pad))
        ref_plan.append(("linear", w, b))
        if i == 0:
            plan.append(("instnorm", d, d_pad))
            ref_plan.append(("instnorm",))
        plan.append(("swish",))
        ref_plan.append(("swish",))
        w1_idx, b1_idx, _, w1, b1 = add_linear(keys[ki], d, d)
        ki += 1
        w2_idx, b2_idx, _, w2, b2 = add_linear(keys[ki], d, d)
        ki += 1
        plan.append(("resblock", w1_idx, b1_idx, w2_idx, b2_idx, d_pad))
        ref_plan.append(("resblock", w1, b1, w2, b2))
        d_prev = d
    w_idx, b_idx, d_pad, w, b = add_linear(keys[ki], d_prev, out_dim)
    plan.append(("linear", w_idx, b_idx, d_pad))
    ref_plan.append(("linear", w, b))

    # Pack all biases into one (num_biases, max_dpad) f32 slab -> one DMA.
    max_dpad = max(wp.shape[1] for wp in weights)
    slab = jnp.zeros((len(biases), max_dpad), jnp.float32)
    for r, bvec in enumerate(biases):
        slab = slab.at[r, :bvec.shape[0]].set(bvec)

    return weights, slab, tuple(plan), ref_plan


def vector_encoder_forward(x, weights, bias_slab, plan, out_dim,
                           block_b=None, compute_dtype=jnp.bfloat16):
    B, in_dim = x.shape
    in_dim_pad = weights[0].shape[0]
    out_dim_pad = weights[-1].shape[1]
    max_d = max([in_dim_pad, out_dim_pad] + [w.shape[1] for w in weights])

    usable_vmem, num_tc, mxu_rows = _tpu_hw_info()

    param_bytes = bias_slab.size * bias_slab.dtype.itemsize
    param_bytes += sum(w.size * w.dtype.itemsize for w in weights)
    if param_bytes > int(0.6 * usable_vmem):
        # TODO(synk): weight-tiling fallback (inner grid axis over K/N chunks
        # or pltpu.emit_pipeline over weight slabs) when parameters outgrow
        # VMEM; matters for very wide inner_dims on v7x's 64 MiB per-core VMEM.
        raise ValueError(
            f"parameter set ({param_bytes} B) exceeds 60% of usable VMEM "
            f"({usable_vmem} B); the all-resident weight scheme would spill/OOM")

    in_itemsize = jnp.dtype(compute_dtype).itemsize
    out_itemsize = jnp.dtype(x.dtype).itemsize

    # --- batch tile: derived from the VMEM budget, MXU-row granular when the
    # batch is large, >= 2 pipelined steps per core on multi-TC chips. ---
    if block_b is None:
        bytes_per_row = (2 * in_dim_pad * in_itemsize      # double-buffered x tile
                         + 2 * out_dim_pad * out_itemsize  # double-buffered out tile
                         + 8 * max_d * 4)                  # live f32 activations
        avail = usable_vmem - param_bytes - (4 << 20)
        cap_rows = int(min(max(avail // max(bytes_per_row, 1), 16), 1024))
        gran = mxu_rows if B >= mxu_rows else 16
        block_b = min(_round_up(B, gran), max((cap_rows // gran) * gran, gran))
        if num_tc > 1:
            min_steps = 2 * num_tc  # >= 2 steps per core after megacore sharding
            if B >= min_steps * 16 and pl.cdiv(B, block_b) < min_steps:
                block_b = _round_up(pl.cdiv(B, min_steps), 16)
    block_b = max(16, _round_up(int(block_b), 16))  # bf16 (16,128) packing
    B_pad = _round_up(B, block_b)
    grid = (B_pad // block_b,)

    # Pad batch rows / input feature lanes (only if needed), then cast once to
    # the DMA dtype (bf16) -> half the streamed-input HBM traffic.
    xp = x
    if (B_pad != B) or (in_dim_pad != in_dim):
        xp = jnp.pad(xp, ((0, B_pad - B), (0, in_dim_pad - in_dim)))
    xp = xp.astype(compute_dtype)

    kernel = _make_kernel(plan, compute_dtype)

    const2d = lambda i: (0, 0)
    in_specs = [pl.BlockSpec((block_b, in_dim_pad), lambda i: (i, 0))]
    # Parameters: constant index_map -> single-buffered, fully resident.
    in_specs.append(pl.BlockSpec(bias_slab.shape, const2d,
                                 pipeline_mode=pl.Buffered(1)))
    in_specs += [pl.BlockSpec(w.shape, const2d, pipeline_mode=pl.Buffered(1))
                 for w in weights]
    out_spec = pl.BlockSpec((block_b, out_dim_pad), lambda i: (i, 0))

    vmem_budget = (param_bytes
                   + 2 * block_b * in_dim_pad * in_itemsize
                   + 2 * block_b * out_dim_pad * out_itemsize
                   + 8 * block_b * max_d * 4
                   + (4 << 20))
    vmem_limit = int(min(max(vmem_budget, 32 << 20), usable_vmem))

    out = pl.pallas_call(
        kernel,
        out_shape=jax.ShapeDtypeStruct((B_pad, out_dim_pad), x.dtype),
        grid_spec=pltpu.PrefetchScalarGridSpec(
            num_scalar_prefetch=0,
            grid=grid,
            in_specs=in_specs,
            out_specs=out_spec,
        ),
        compiler_params=pltpu.CompilerParams(
            dimension_semantics=("parallel",),
            vmem_limit_bytes=vmem_limit,
        ),
    )(xp, bias_slab, *weights)

    return out[:B, :out_dim]


def vector_encoder_reference(x, ref_plan):
    """Pure-JAX f32 reference with the module's exact semantics."""
    h = x.astype(jnp.float32)
    for op in ref_plan:
        kind = op[0]
        if kind == "linear":
            h = h @ op[1] + op[2]
        elif kind == "instnorm":
            mu = jnp.mean(h, axis=-1, keepdims=True)
            var = jnp.mean((h - mu) ** 2, axis=-1, keepdims=True)
            h = (h - mu) / jnp.sqrt(var + EPS)
        elif kind == "swish":
            h = h * jax.nn.sigmoid(h)
        elif kind == "resblock":
            t = h @ op[1] + op[2]
            t = t * jax.nn.sigmoid(t)
            t = t @ op[3] + op[4]
            h = h + t
    return h.astype(x.dtype)


if __name__ == "__main__":
    key = jax.random.PRNGKey(0)
    k_x, k_p = jax.random.split(key)

    batch = 32
    in_dim = 16
    inner_dims = (32, 64)
    out_dim = 8

    x = jax.random.normal(k_x, (batch, in_dim), dtype=jnp.float32)
    weights, bias_slab, plan, ref_plan = make_vector_encoder_params(
        k_p, in_dim, inner_dims, out_dim)

    out = jax.block_until_ready(
        vector_encoder_forward(x, weights, bias_slab, plan, out_dim))
    ref = jax.block_until_ready(vector_encoder_reference(x, ref_plan))

    assert out.shape == (batch, out_dim)
    # bf16 matmul operands (f32 accumulation) -> loosened tolerance.
    err = float(jnp.max(jnp.abs(out.astype(jnp.float32) - ref)))
    scale = float(jnp.max(jnp.abs(ref))) + 1.0
    assert err < 5e-2 * scale, f"Pallas output mismatch: max err {err}, scale {scale}"

    print("KERNEL_OK")
</pallas_src>

<mosaic_0001>
module attributes {stable_mosaic.version = 11 : i64} {
  func.func @kernel(%arg0: i32, %arg1: memref<32x128xbf16, #tpu.memory_space<vmem>>, %arg2: memref<7x128xf32, #tpu.memory_space<vmem>>, %arg3: memref<128x128xbf16, #tpu.memory_space<vmem>>, %arg4: memref<128x128xbf16, #tpu.memory_space<vmem>>, %arg5: memref<128x128xbf16, #tpu.memory_space<vmem>>, %arg6: memref<128x128xbf16, #tpu.memory_space<vmem>>, %arg7: memref<128x128xbf16, #tpu.memory_space<vmem>>, %arg8: memref<128x128xbf16, #tpu.memory_space<vmem>>, %arg9: memref<128x128xbf16, #tpu.memory_space<vmem>>, %arg10: memref<32x128xf32, #tpu.memory_space<vmem>>) attributes {dimension_semantics = [#tpu.dimension_semantics<parallel>], iteration_bounds = array<i64: 1>, scalar_prefetch = 0 : i64, scratch_operands = 0 : i64, tpu.core_type = #tpu.core_type<tc>, window_params = [{transform_indices = @transform_0, window_bounds = array<i64: 32, 128>}, {pipeline_mode = #tpu.pipeline_mode<synchronous>, transform_indices = @transform_1, window_bounds = array<i64: 7, 128>}, {pipeline_mode = #tpu.pipeline_mode<synchronous>, transform_indices = @transform_2, window_bounds = array<i64: 128, 128>}, {pipeline_mode = #tpu.pipeline_mode<synchronous>, transform_indices = @transform_3, window_bounds = array<i64: 128, 128>}, {pipeline_mode = #tpu.pipeline_mode<synchronous>, transform_indices = @transform_4, window_bounds = array<i64: 128, 128>}, {pipeline_mode = #tpu.pipeline_mode<synchronous>, transform_indices = @transform_5, window_bounds = array<i64: 128, 128>}, {pipeline_mode = #tpu.pipeline_mode<synchronous>, transform_indices = @transform_6, window_bounds = array<i64: 128, 128>}, {pipeline_mode = #tpu.pipeline_mode<synchronous>, transform_indices = @transform_7, window_bounds = array<i64: 128, 128>}, {pipeline_mode = #tpu.pipeline_mode<synchronous>, transform_indices = @transform_8, window_bounds = array<i64: 128, 128>}, {transform_indices = @transform_9, window_bounds = array<i64: 32, 128>}]} {
    %c0 = arith.constant 0 : index
    %c0_0 = arith.constant 0 : index
    %0 = vector.load %arg1[%c0, %c0_0] : memref<32x128xbf16, #tpu.memory_space<vmem>>, vector<32x128xbf16>
    %c0_1 = arith.constant 0 : index
    %c0_2 = arith.constant 0 : index
    %1 = vector.load %arg3[%c0_1, %c0_2] : memref<128x128xbf16, #tpu.memory_space<vmem>>, vector<128x128xbf16>
    %cst = arith.constant dense<0.000000e+00> : vector<32x128xf32>
    %2 = tpu.matmul %0, %1, %cst {dimension_numbers = #tpu.dot_dimension_numbers<[1], [0], [0], [1], [0, 0, 1, 1], [], []>} : vector<32x128xbf16>, vector<128x128xbf16>, vector<32x128xf32> -> vector<32x128xf32>
    %c0_3 = arith.constant 0 : index
    %c0_4 = arith.constant 0 : index
    %3 = vector.load %arg2[%c0_3, %c0_4] : memref<7x128xf32, #tpu.memory_space<vmem>>, vector<1x128xf32>
    %4 = vector.broadcast %3 : vector<1x128xf32> to vector<32x128xf32>
    %5 = arith.addf %2, %4 : vector<32x128xf32>
    %cst_5 = arith.constant dense<0.000000e+00> : vector<32xf32>
    %6 = vector.multi_reduction <add>, %5, %cst_5 [1] : vector<32x128xf32> to vector<32xf32>
    %7 = vector.shape_cast %6 : vector<32xf32> to vector<32x1xf32>
    %cst_6 = arith.constant 3.125000e-02 : f32
    %8 = vector.broadcast %cst_6 : f32 to vector<32x1xf32>
    %9 = arith.mulf %7, %8 : vector<32x1xf32>
    %10 = arith.mulf %5, %5 : vector<32x128xf32>
    %cst_7 = arith.constant dense<0.000000e+00> : vector<32xf32>
    %11 = vector.multi_reduction <add>, %10, %cst_7 [1] : vector<32x128xf32> to vector<32xf32>
    %12 = vector.shape_cast %11 : vector<32xf32> to vector<32x1xf32>
    %cst_8 = arith.constant 3.125000e-02 : f32
    %13 = vector.broadcast %cst_8 : f32 to vector<32x1xf32>
    %14 = arith.mulf %12, %13 : vector<32x1xf32>
    %15 = arith.mulf %9, %9 : vector<32x1xf32>
    %16 = arith.subf %14, %15 : vector<32x1xf32>
    %cst_9 = arith.constant 0.000000e+00 : f32
    %17 = vector.broadcast %cst_9 : f32 to vector<32x1xf32>
    %18 = arith.maximumf %16, %17 : vector<32x1xf32>
    %19 = vector.broadcast %9 : vector<32x1xf32> to vector<32x128xf32>
    %20 = arith.subf %5, %19 : vector<32x128xf32>
    %cst_10 = arith.constant 9.99999974E-6 : f32
    %21 = vector.broadcast %cst_10 : f32 to vector<32x1xf32>
    %22 = arith.addf %18, %21 : vector<32x1xf32>
    %23 = math.rsqrt %22 : vector<32x1xf32>
    %24 = vector.broadcast %23 : vector<32x1xf32> to vector<32x128xf32>
    %25 = arith.mulf %20, %24 : vector<32x128xf32>
    %cst_11 = arith.constant 5.000000e-01 : f32
    %26 = vector.broadcast %cst_11 : f32 to vector<32x128xf32>
    %27 = arith.mulf %26, %25 : vector<32x128xf32>
    %cst_12 = arith.constant 5.000000e-01 : f32
    %28 = vector.broadcast %cst_12 : f32 to vector<32x128xf32>
    %29 = arith.mulf %28, %25 : vector<32x128xf32>
    %30 = math.tanh %29 : vector<32x128xf32>
    %cst_13 = arith.constant 1.000000e+00 : f32
    %31 = vector.broadcast %cst_13 : f32 to vector<32x128xf32>
    %32 = arith.addf %31, %30 : vector<32x128xf32>
    %33 = arith.mulf %27, %32 : vector<32x128xf32>
    %c0_14 = arith.constant 0 : index
    %c0_15 = arith.constant 0 : index
    %34 = vector.load %arg4[%c0_14, %c0_15] : memref<128x128xbf16, #tpu.memory_space<vmem>>, vector<128x128xbf16>
    %c0_16 = arith.constant 0 : index
    %c0_17 = arith.constant 0 : index
    %35 = vector.load %arg5[%c0_16, %c0_17] : memref<128x128xbf16, #tpu.memory_space<vmem>>, vector<128x128xbf16>
    %36 = arith.truncf %33 : vector<32x128xf32> to vector<32x128xbf16>
    %cst_18 = arith.constant dense<0.000000e+00> : vector<32x128xf32>
    %37 = tpu.matmul %36, %34, %cst_18 {dimension_numbers = #tpu.dot_dimension_numbers<[1], [0], [0], [1], [0, 0, 1, 1], [], []>} : vector<32x128xbf16>, vector<128x128xbf16>, vector<32x128xf32> -> vector<32x128xf32>
    %c1 = arith.constant 1 : index
    %c0_19 = arith.constant 0 : index
    %38 = vector.load %arg2[%c1, %c0_19] : memref<7x128xf32, #tpu.memory_space<vmem>>, vector<1x128xf32>
    %39 = vector.broadcast %38 : vector<1x128xf32> to vector<32x128xf32>
    %40 = arith.addf %37, %39 : vector<32x128xf32>
    %cst_20 = arith.constant 5.000000e-01 : f32
    %41 = vector.broadcast %cst_20 : f32 to vector<32x128xf32>
    %42 = arith.mulf %41, %40 : vector<32x128xf32>
    %cst_21 = arith.constant 5.000000e-01 : f32
    %43 = vector.broadcast %cst_21 : f32 to vector<32x128xf32>
    %44 = arith.mulf %43, %40 : vector<32x128xf32>
    %45 = math.tanh %44 : vector<32x128xf32>
    %cst_22 = arith.constant 1.000000e+00 : f32
    %46 = vector.broadcast %cst_22 : f32 to vector<32x128xf32>
    %47 = arith.addf %46, %45 : vector<32x128xf32>
    %48 = arith.mulf %42, %47 : vector<32x128xf32>
    %49 = arith.truncf %48 : vector<32x128xf32> to vector<32x128xbf16>
    %cst_23 = arith.constant dense<0.000000e+00> : vector<32x128xf32>
    %50 = tpu.matmul %49, %35, %cst_23 {dimension_numbers = #tpu.dot_dimension_numbers<[1], [0], [0], [1], [0, 0, 1, 1], [], []>} : vector<32x128xbf16>, vector<128x128xbf16>, vector<32x128xf32> -> vector<32x128xf32>
    %c2 = arith.constant 2 : index
    %c0_24 = arith.constant 0 : index
    %51 = vector.load %arg2[%c2, %c0_24] : memref<7x128xf32, #tpu.memory_space<vmem>>, vector<1x128xf32>
    %52 = vector.broadcast %51 : vector<1x128xf32> to vector<32x128xf32>
    %53 = arith.addf %50, %52 : vector<32x128xf32>
    %54 = arith.addf %33, %53 : vector<32x128xf32>
    %c0_25 = arith.constant 0 : index
    %c0_26 = arith.constant 0 : index
    %55 = vector.load %arg6[%c0_25, %c0_26] : memref<128x128xbf16, #tpu.memory_space<vmem>>, vector<128x128xbf16>
    %56 = arith.truncf %54 : vector<32x128xf32> to vector<32x128xbf16>
    %cst_27 = arith.constant dense<0.000000e+00> : vector<32x128xf32>
    %57 = tpu.matmul %56, %55, %cst_27 {dimension_numbers = #tpu.dot_dimension_numbers<[1], [0], [0], [1], [0, 0, 1, 1], [], []>} : vector<32x128xbf16>, vector<128x128xbf16>, vector<32x128xf32> -> vector<32x128xf32>
    %c3 = arith.constant 3 : index
    %c0_28 = arith.constant 0 : index
    %58 = vector.load %arg2[%c3, %c0_28] : memref<7x128xf32, #tpu.memory_space<vmem>>, vector<1x128xf32>
    %59 = vector.broadcast %58 : vector<1x128xf32> to vector<32x128xf32>
    %60 = arith.addf %57, %59 : vector<32x128xf32>
    %cst_29 = arith.constant 5.000000e-01 : f32
    %61 = vector.broadcast %cst_29 : f32 to vector<32x128xf32>
    %62 = arith.mulf %61, %60 : vector<32x128xf32>
    %cst_30 = arith.constant 5.000000e-01 : f32
    %63 = vector.broadcast %cst_30 : f32 to vector<32x128xf32>
    %64 = arith.mulf %63, %60 : vector<32x128xf32>
    %65 = math.tanh %64 : vector<32x128xf32>
    %cst_31 = arith.constant 1.000000e+00 : f32
    %66 = vector.broadcast %cst_31 : f32 to vector<32x128xf32>
    %67 = arith.addf %66, %65 : vector<32x128xf32>
    %68 = arith.mulf %62, %67 : vector<32x128xf32>
    %c0_32 = arith.constant 0 : index
    %c0_33 = arith.constant 0 : index
    %69 = vector.load %arg7[%c0_32, %c0_33] : memref<128x128xbf16, #tpu.memory_space<vmem>>, vector<128x128xbf16>
    %c0_34 = arith.constant 0 : index
    %c0_35 = arith.constant 0 : index
    %70 = vector.load %arg8[%c0_34, %c0_35] : memref<128x128xbf16, #tpu.memory_space<vmem>>, vector<128x128xbf16>
    %71 = arith.truncf %68 : vector<32x128xf32> to vector<32x128xbf16>
    %cst_36 = arith.constant dense<0.000000e+00> : vector<32x128xf32>
    %72 = tpu.matmul %71, %69, %cst_36 {dimension_numbers = #tpu.dot_dimension_numbers<[1], [0], [0], [1], [0, 0, 1, 1], [], []>} : vector<32x128xbf16>, vector<128x128xbf16>, vector<32x128xf32> -> vector<32x128xf32>
    %c4 = arith.constant 4 : index
    %c0_37 = arith.constant 0 : index
    %73 = vector.load %arg2[%c4, %c0_37] : memref<7x128xf32, #tpu.memory_space<vmem>>, vector<1x128xf32>
    %74 = vector.broadcast %73 : vector<1x128xf32> to vector<32x128xf32>
    %75 = arith.addf %72, %74 : vector<32x128xf32>
    %cst_38 = arith.constant 5.000000e-01 : f32
    %76 = vector.broadcast %cst_38 : f32 to vector<32x128xf32>
    %77 = arith.mulf %76, %75 : vector<32x128xf32>
    %cst_39 = arith.constant 5.000000e-01 : f32
    %78 = vector.broadcast %cst_39 : f32 to vector<32x128xf32>
    %79 = arith.mulf %78, %75 : vector<32x128xf32>
    %80 = math.tanh %79 : vector<32x128xf32>
    %cst_40 = arith.constant 1.000000e+00 : f32
    %81 = vector.broadcast %cst_40 : f32 to vector<32x128xf32>
    %82 = arith.addf %81, %80 : vector<32x128xf32>
    %83 = arith.mulf %77, %82 : vector<32x128xf32>
    %84 = arith.truncf %83 : vector<32x128xf32> to vector<32x128xbf16>
    %cst_41 = arith.constant dense<0.000000e+00> : vector<32x128xf32>
    %85 = tpu.matmul %84, %70, %cst_41 {dimension_numbers = #tpu.dot_dimension_numbers<[1], [0], [0], [1], [0, 0, 1, 1], [], []>} : vector<32x128xbf16>, vector<128x128xbf16>, vector<32x128xf32> -> vector<32x128xf32>
    %c5 = arith.constant 5 : index
    %c0_42 = arith.constant 0 : index
    %86 = vector.load %arg2[%c5, %c0_42] : memref<7x128xf32, #tpu.memory_space<vmem>>, vector<1x128xf32>
    %87 = vector.broadcast %86 : vector<1x128xf32> to vector<32x128xf32>
    %88 = arith.addf %85, %87 : vector<32x128xf32>
    %89 = arith.addf %68, %88 : vector<32x128xf32>
    %c0_43 = arith.constant 0 : index
    %c0_44 = arith.constant 0 : index
    %90 = vector.load %arg9[%c0_43, %c0_44] : memref<128x128xbf16, #tpu.memory_space<vmem>>, vector<128x128xbf16>
    %91 = arith.truncf %89 : vector<32x128xf32> to vector<32x128xbf16>
    %cst_45 = arith.constant dense<0.000000e+00> : vector<32x128xf32>
    %92 = tpu.matmul %91, %90, %cst_45 {dimension_numbers = #tpu.dot_dimension_numbers<[1], [0], [0], [1], [0, 0, 1, 1], [], []>} : vector<32x128xbf16>, vector<128x128xbf16>, vector<32x128xf32> -> vector<32x128xf32>
    %c6 = arith.constant 6 : index
    %c0_46 = arith.constant 0 : index
    %93 = vector.load %arg2[%c6, %c0_46] : memref<7x128xf32, #tpu.memory_space<vmem>>, vector<1x128xf32>
    %94 = vector.broadcast %93 : vector<1x128xf32> to vector<32x128xf32>
    %95 = arith.addf %92, %94 : vector<32x128xf32>
    %c0_47 = arith.constant 0 : index
    %c0_48 = arith.constant 0 : index
    %96 = vector.load %arg10[%c0_47, %c0_48] : memref<32x128xf32, #tpu.memory_space<vmem>>, vector<32x128xf32>
    tpu.vector_store %arg10[%c0_47, %c0_48], %95 {strides = array<i32>} : memref<32x128xf32, #tpu.memory_space<vmem>>, vector<32x128xf32>,
    return
  }
  func.func @transform_0(%arg0: i32) -> (i32, i32) {
    %c0_i32 = arith.constant 0 : i32
    %c0_i32_0 = arith.constant 0 : i32
    return %arg0, %c0_i32 : i32, i32
  }
  func.func @transform_1(%arg0: i32) -> (i32, i32) {
    %c0_i32 = arith.constant 0 : i32
    %c0_i32_0 = arith.constant 0 : i32
    %c0_i32_1 = arith.constant 0 : i32
    return %c0_i32, %c0_i32_0 : i32, i32
  }
  func.func @transform_2(%arg0: i32) -> (i32, i32) {
    %c0_i32 = arith.constant 0 : i32
    %c0_i32_0 = arith.constant 0 : i32
    %c0_i32_1 = arith.constant 0 : i32
    return %c0_i32, %c0_i32_0 : i32, i32
  }
  func.func @transform_3(%arg0: i32) -> (i32, i32) {
    %c0_i32 = arith.constant 0 : i32
    %c0_i32_0 = arith.constant 0 : i32
    %c0_i32_1 = arith.constant 0 : i32
    return %c0_i32, %c0_i32_0 : i32, i32
  }
  func.func @transform_4(%arg0: i32) -> (i32, i32) {
    %c0_i32 = arith.constant 0 : i32
    %c0_i32_0 = arith.constant 0 : i32
    %c0_i32_1 = arith.constant 0 : i32
    return %c0_i32, %c0_i32_0 : i32, i32
  }
  func.func @transform_5(%arg0: i32) -> (i32, i32) {
    %c0_i32 = arith.constant 0 : i32
    %c0_i32_0 = arith.constant 0 : i32
    %c0_i32_1 = arith.constant 0 : i32
    return %c0_i32, %c0_i32_0 : i32, i32
  }
  func.func @transform_6(%arg0: i32) -> (i32, i32) {
    %c0_i32 = arith.constant 0 : i32
    %c0_i32_0 = arith.constant 0 : i32
    %c0_i32_1 = arith.constant 0 : i32
    return %c0_i32, %c0_i32_0 : i32, i32
  }
  func.func @transform_7(%arg0: i32) -> (i32, i32) {
    %c0_i32 = arith.constant 0 : i32
    %c0_i32_0 = arith.constant 0 : i32
    %c0_i32_1 = arith.constant 0 : i32
    return %c0_i32, %c0_i32_0 : i32, i32
  }
  func.func @transform_8(%arg0: i32) -> (i32, i32) {
    %c0_i32 = arith.constant 0 : i32
    %c0_i32_0 = arith.constant 0 : i32
    %c0_i32_1 = arith.constant 0 : i32
    return %c0_i32, %c0_i32_0 : i32, i32
  }
  func.func @transform_9(%arg0: i32) -> (i32, i32) {
    %c0_i32 = arith.constant 0 : i32
    %c0_i32_0 = arith.constant 0 : i32
    return %arg0, %c0_i32 : i32, i32
  }
}

</mosaic_0001>

<bundles_post_ra>
// kernel: tpu_custom_call.1
= control target key start
LH: loop header
LB: loop body
LE: loop exit
PB: predicated region body
PF: predicated region fallthrough
CT: control target
= control target key end

     0   :  { %14 = vsyncpa [#allocation3], 0  ;;  %s2044_s0 = inlined_call_operand.hbm [shape: bf16[32,128], index: 0, kind: input, shape index: {}]   ;;  %s2045_s1 = inlined_call_operand.hbm [shape: f32[7,128], index: 1, kind: input, shape index: {}]   ;;  %s2046_s2 = inlined_call_operand.hbm [shape: bf16[128,128], index: 2, kind: input, shape index: {}]   ;;  %s2047_s3 = inlined_call_operand.hbm [shape: bf16[128,128], index: 3, kind: input, shape index: {}]   ;;  %s2048_s4 = inlined_call_operand.hbm [shape: bf16[128,128], index: 4, kind: input, shape index: {}]   ;;  %s2049_s5 = inlined_call_operand.hbm [shape: bf16[128,128], index: 5, kind: input, shape index: {}]   ;;  %s2050_s6 = inlined_call_operand.hbm [shape: bf16[128,128], index: 6, kind: input, shape index: {}]   ;;  %s2051_s7 = inlined_call_operand.hbm [shape: bf16[128,128], index: 7, kind: input, shape index: {}]   ;;  %s2052_s8 = inlined_call_operand.hbm [shape: bf16[128,128], index: 8, kind: input, shape index: {}]   ;;  %s2053_s9 = inlined_call_operand.hbm [shape: f32[32,128], index: 9, kind: output, shape index: {}]  }
   0x1   :  { %15 = vsyncpa [#allocation6], 0 }
   0x2   :  { %16 = vsyncpa [#allocation9], 0 }
   0x3   :  { %17 = vsyncpa [#allocation12], 0 }
   0x4   :  { %18 = vsyncpa [#allocation15], 0 }
   0x5   :  { %19 = vsyncpa [#allocation4], 0  ;;  %s1780_s30 = smov [#allocation5]   ;;  %s1548_s13 = scalar_lea.hbm %s2045_s1, 128 }
   0x6   :  { %s38_s10 = sshll.u32 %s1780_s30, 4  ;;  %p1549_p0 = scmp.ne.s32.totalorder %s2045_s1, %s1548_s13  ;;  %s39_s10 = int_to_ptr.vmem [resolvable:$true] %s38_s10 }
   0x7   :  { %p1552_p1 = scmp.lt.u32.totalorder %s1548_s13, %s2045_s1 }
   0x9   :  { %p1554_p2 = pnand %p1552_p1, %p1549_p0 }
   0xb   :  { %1557 = shalt.err (!%p1554_p2)
}
   0xc   :  { %s1558_s18 = scalar_lea.vmem %s39_s10, 128  ;;  %p1563_p4 = scmp.lt.s32.totalorder %s39_s10, %s39_s10 }
   0xd   :  { %p1559_p3 = scmp.ne.s32.totalorder %s39_s10, %s1558_s18  ;;  %p1564_p5 = scmp.lt.s32.totalorder %s1558_s18, %s1558_s18 }
   0xf   :  { %p1565_p6 = por %p1564_p5, %p1563_p4 }
  0x11   :  { %p1566_p7 = pnand %p1565_p6, %p1559_p3 }
  0x13   :  { %1569 = shalt.err (!%p1566_p7)
}
  0x14   :  { %41 = dma.hbm_to_vmem [thread:$0]  %s2045_s1, 128, %s39_s10, [#allocation6]  }
  0x15   :  { %s1781_s21 = smov [#allocation8]   ;;  %s1782_s23 = smov [#allocation11]  }
  0x16   :  { %s59_s22 = sshll.u32 %s1781_s21, 4  ;;  %s83_s24 = sshll.u32 %s1782_s23, 4  ;;  %s60_s22 = int_to_ptr.vmem [resolvable:$true] %s59_s22  ;;  %s84_s24 = int_to_ptr.vmem [resolvable:$true] %s83_s24 }
  0x17   :  { %s1570_s27 = scalar_lea.hbm %s2047_s3, 1024 }
  0x18   :  { %p1571_p8 = scmp.ne.s32.totalorder %s2047_s3, %s1570_s27  ;;  %p1574_p9 = scmp.lt.u32.totalorder %s1570_s27, %s2047_s3 }
  0x1a   :  { %p1576_p10 = pnand %p1574_p9, %p1571_p8 }
  0x1c   :  { %1579 = shalt.err (!%p1576_p10)
}
  0x1d   :  { %s1580_s1 = scalar_lea.vmem %s60_s22, 1024  ;;  %p1585_p12 = scmp.lt.s32.totalorder %s60_s22, %s60_s22 }
  0x1e   :  { %p1581_p11 = scmp.ne.s32.totalorder %s60_s22, %s1580_s1  ;;  %p1586_p13 = scmp.lt.s32.totalorder %s1580_s1, %s1580_s1 }
  0x20   :  { %p1587_p0 = por %p1586_p13, %p1585_p12 }
  0x22   :  { %p1588_p1 = pnand %p1587_p0, %p1581_p11 }
  0x24   :  { %1591 = shalt.err (!%p1588_p1)
}
  0x25   :  { %s1783_s10 = smov 64   ;;  %s1784_s12 = smov 4  }
  0x26   :  { %65 = dma.hbm_to_vmem [thread:$0]  %s2047_s3, 1024, %s60_s22, [#allocation9], %s1783_s10, %s1783_s10, %s1784_s12  }
  0x27   :  { %s1592_s17 = scalar_lea.hbm %s2049_s5, 1024 }
  0x28   :  { %p1593_p2 = scmp.ne.s32.totalorder %s2049_s5, %s1592_s17  ;;  %p1596_p3 = scmp.lt.u32.totalorder %s1592_s17, %s2049_s5 }
  0x2a   :  { %p1598_p4 = pnand %p1596_p3, %p1593_p2 }
  0x2c   :  { %1601 = shalt.err (!%p1598_p4)
}
  0x2d   :  { %s1602_s23 = scalar_lea.vmem %s84_s24, 1024  ;;  %p1607_p6 = scmp.lt.s32.totalorder %s84_s24, %s84_s24 }
  0x2e   :  { %p1603_p5 = scmp.ne.s32.totalorder %s84_s24, %s1602_s23  ;;  %p1608_p7 = scmp.lt.s32.totalorder %s1602_s23, %s1602_s23 }
  0x30   :  { %p1609_p8 = por %p1608_p7, %p1607_p6 }
  0x32   :  { %p1610_p9 = pnand %p1609_p8, %p1603_p5 }
  0x34   :  { %1613 = shalt.err (!%p1610_p9)
}
  0x35   :  { %89 = dma.hbm_to_vmem [thread:$0]  %s2049_s5, 1024, %s84_s24, [#allocation12], %s1783_s10, %s1783_s10, %s1784_s12  }
  0x36   :  { %s1785_s25 = smov [#allocation14]   ;;  %s1786_s27 = smov [#allocation2]  }
  0x37   :  { %s107_s26 = sshll.u32 %s1785_s25, 4  ;;  %s25_s28 = sshll.u32 %s1786_s27, 4  ;;  %s108_s26 = int_to_ptr.vmem [resolvable:$true] %s107_s26  ;;  %s26_s28 = int_to_ptr.vmem [resolvable:$true] %s25_s28 }
  0x38   :  { %s1614_s11 = scalar_lea.hbm %s2051_s7, 1024 }
  0x39   :  { %p1615_p10 = scmp.ne.s32.totalorder %s2051_s7, %s1614_s11  ;;  %p1618_p11 = scmp.lt.u32.totalorder %s1614_s11, %s2051_s7 }
  0x3b   :  { %p1620_p12 = pnand %p1618_p11, %p1615_p10 }
  0x3d   :  { %1623 = shalt.err (!%p1620_p12)
}
  0x3e   :  { %s1624_s5 = scalar_lea.vmem %s108_s26, 1024  ;;  %p1629_p0 = scmp.lt.s32.totalorder %s108_s26, %s108_s26 }
  0x3f   :  { %p1625_p13 = scmp.ne.s32.totalorder %s108_s26, %s1624_s5  ;;  %p1630_p1 = scmp.lt.s32.totalorder %s1624_s5, %s1624_s5 }
  0x41   :  { %p1631_p2 = por %p1630_p1, %p1629_p0 }
  0x43   :  { %p1632_p3 = pnand %p1631_p2, %p1625_p13 }
  0x45   :  { %1635 = shalt.err (!%p1632_p3)
}
  0x46   :  { %113 = dma.hbm_to_vmem [thread:$0]  %s2051_s7, 1024, %s108_s26, [#allocation15], %s1783_s10, %s1783_s10, %s1784_s12  }
  0x47   :  { %s1636_s19 = scalar_lea.hbm %s2044_s0, 256 }
  0x48   :  { %p1637_p4 = scmp.ne.s32.totalorder %s2044_s0, %s1636_s19  ;;  %p1640_p5 = scmp.lt.u32.totalorder %s1636_s19, %s2044_s0 }
  0x4a   :  { %p1642_p6 = pnand %p1640_p5, %p1637_p4 }
  0x4c   :  { %1645 = shalt.err (!%p1642_p6)
}
  0x4d   :  { %s1646_s22 = scalar_lea.vmem %s26_s28, 256  ;;  %p1651_p8 = scmp.lt.s32.totalorder %s26_s28, %s26_s28 }
  0x4e   :  { %p1647_p7 = scmp.ne.s32.totalorder %s26_s28, %s1646_s22  ;;  %p1652_p9 = scmp.lt.s32.totalorder %s1646_s22, %s1646_s22 }
  0x50   :  { %p1653_p10 = por %p1652_p9, %p1651_p8 }
  0x52   :  { %p1654_p11 = pnand %p1653_p10, %p1647_p7 }
  0x54   :  { %1657 = shalt.err (!%p1654_p11)
}
  0x55   :  { %31 = dma.hbm_to_vmem [thread:$0]  %s2044_s0, 256, %s26_s28, [#allocation3], %s1783_s10, %s1783_s10, %s1784_s12  }
  0x56   :  { %s1787_s26 = smov [#allocation7]   ;;  %s1788_s29 = smov [#allocation10]  }
  0x57   :  { %s47_s27 = sshll.u32 %s1787_s26, 4  ;;  %s71_s30 = sshll.u32 %s1788_s29, 4  ;;  %s48_s27 = int_to_ptr.vmem [resolvable:$true] %s47_s27  ;;  %s72_s30 = int_to_ptr.vmem [resolvable:$true] %s71_s30 }
  0x58   :  { %s1658_s13 = scalar_lea.hbm %s2046_s2, 1024 }
  0x59   :  { %p1659_p12 = scmp.ne.s32.totalorder %s2046_s2, %s1658_s13  ;;  %p1662_p13 = scmp.lt.u32.totalorder %s1658_s13, %s2046_s2 }
  0x5b   :  { %p1664_p0 = pnand %p1662_p13, %p1659_p12 }
  0x5d   :  { %1667 = shalt.err (!%p1664_p0)
}
  0x5e   :  { %s1668_s0 = scalar_lea.vmem %s48_s27, 1024  ;;  %p1673_p2 = scmp.lt.s32.totalorder %s48_s27, %s48_s27 }
  0x5f   :  { %p1669_p1 = scmp.ne.s32.totalorder %s48_s27, %s1668_s0  ;;  %p1674_p3 = scmp.lt.s32.totalorder %s1668_s0, %s1668_s0 }
  0x61   :  { %p1675_p4 = por %p1674_p3, %p1673_p2 }
  0x63   :  { %p1676_p5 = pnand %p1675_p4, %p1669_p1 }
  0x65   :  { %1679 = shalt.err (!%p1676_p5)
}
  0x66   :  { %53 = dma.hbm_to_vmem [thread:$0]  %s2046_s2, 1024, %s48_s27, [#allocation6], %s1783_s10, %s1783_s10, %s1784_s12  }
  0x67   :  { %s1680_s19 = scalar_lea.hbm %s2048_s4, 1024 }
  0x68   :  { %p1681_p6 = scmp.ne.s32.totalorder %s2048_s4, %s1680_s19  ;;  %p1684_p7 = scmp.lt.u32.totalorder %s1680_s19, %s2048_s4 }
  0x6a   :  { %p1686_p8 = pnand %p1684_p7, %p1681_p6 }
  0x6c   :  { %1689 = shalt.err (!%p1686_p8)
}
  0x6d   :  { %s1690_s22 = scalar_lea.vmem %s72_s30, 1024  ;;  %p1695_p10 = scmp.lt.s32.totalorder %s72_s30, %s72_s30 }
  0x6e   :  { %p1691_p9 = scmp.ne.s32.totalorder %s72_s30, %s1690_s22  ;;  %p1696_p11 = scmp.lt.s32.totalorder %s1690_s22, %s1690_s22 }
  0x70   :  { %p1697_p12 = por %p1696_p11, %p1695_p10 }
  0x72   :  { %p1698_p13 = pnand %p1697_p12, %p1691_p9 }
  0x74   :  { %1701 = shalt.err (!%p1698_p13)
}
  0x75   :  { %77 = dma.hbm_to_vmem [thread:$0]  %s2048_s4, 1024, %s72_s30, [#allocation9], %s1783_s10, %s1783_s10, %s1784_s12  }
  0x76   :  { %s1789_s25 = smov [#allocation13]   ;;  %s1790_s27 = smov [#allocation16]  }
  0x77   :  { %s95_s26 = sshll.u32 %s1789_s25, 4  ;;  %s119_s29 = sshll.u32 %s1790_s27, 4  ;;  %s96_s26 = int_to_ptr.vmem [resolvable:$true] %s95_s26  ;;  %s120_s29 = int_to_ptr.vmem [resolvable:$true] %s119_s29 }
  0x78   :  { %s1702_s13 = scalar_lea.hbm %s2050_s6, 1024 }
  0x79   :  { %p1703_p0 = scmp.ne.s32.totalorder %s2050_s6, %s1702_s13  ;;  %p1706_p1 = scmp.lt.u32.totalorder %s1702_s13, %s2050_s6 }
  0x7b   :  { %p1708_p2 = pnand %p1706_p1, %p1703_p0 }
  0x7d   :  { %1711 = shalt.err (!%p1708_p2)
}
  0x7e   :  { %s1712_s4 = scalar_lea.vmem %s96_s26, 1024  ;;  %p1717_p4 = scmp.lt.s32.totalorder %s96_s26, %s96_s26 }
  0x7f   :  { %p1713_p3 = scmp.ne.s32.totalorder %s96_s26, %s1712_s4  ;;  %p1718_p5 = scmp.lt.s32.totalorder %s1712_s4, %s1712_s4 }
  0x81   :  { %p1719_p6 = por %p1718_p5, %p1717_p4 }
  0x83   :  { %p1720_p7 = pnand %p1719_p6, %p1713_p3 }
  0x85   :  { %1723 = shalt.err (!%p1720_p7)
}
  0x86   :  { %101 = dma.hbm_to_vmem [thread:$0]  %s2050_s6, 1024, %s96_s26, [#allocation12], %s1783_s10, %s1783_s10, %s1784_s12  }
  0x87   :  { %s1724_s17 = scalar_lea.hbm %s2052_s8, 1024 }
  0x88   :  { %p1725_p8 = scmp.ne.s32.totalorder %s2052_s8, %s1724_s17  ;;  %p1728_p9 = scmp.lt.u32.totalorder %s1724_s17, %s2052_s8 }
  0x8a   :  { %p1730_p10 = pnand %p1728_p9, %p1725_p8 }
  0x8c   :  { %1733 = shalt.err (!%p1730_p10)
}
  0x8d   :  { %s1734_s23 = scalar_lea.vmem %s120_s29, 1024  ;;  %p1739_p12 = scmp.lt.s32.totalorder %s120_s29, %s120_s29 }
  0x8e   :  { %p1735_p11 = scmp.ne.s32.totalorder %s120_s29, %s1734_s23  ;;  %p1740_p13 = scmp.lt.s32.totalorder %s1734_s23, %s1734_s23 }
  0x90   :  { %p1741_p0 = por %p1740_p13, %p1739_p12 }
  0x92   :  { %p1742_p1 = pnand %p1741_p0, %p1735_p11 }
  0x94   :  { %1745 = shalt.err (!%p1742_p1)
}
  0x95   :  { %125 = dma.hbm_to_vmem [thread:$0]  %s2052_s8, 1024, %s120_s29, [#allocation15], %s1783_s10, %s1783_s10, %s1784_s12  }
  0x96   :  { %1768 = dma.done.wait [#allocation3], 256  }
  0x97   :  { %1769 = vsyncadd [#allocation3], 4294967040 }
  0x98   :  { %1770 = dma.done.wait [#allocation6], 1152  }
  0x99   :  { %1771 = vsyncadd [#allocation6], 4294966144 }
  0x9a   :  { %1772 = dma.done.wait [#allocation9], 2048  }
  0x9b   :  { %1773 = vsyncadd [#allocation9], 4294965248 }
  0x9c   :  { %1774 = dma.done.wait [#allocation12], 2048  }
  0x9d   :  { %1775 = vsyncadd [#allocation12], 4294965248 }
  0x9e   :  { %1776 = dma.done.wait [#allocation15], 2048  }
  0x9f   :  { %1777 = vsyncadd [#allocation15], 4294965248  ;;  %v1450_v0 = vld [vmem:[#allocation7] sm:$0xff]   ;;  %v1451_v1 = vld [vmem:[#allocation7 + $0x8] sm:$0xff]   ;;  %s1791_s8 = smov [#allocation17]  }
  0xa0   :  { %1296 = vmatprep.subr.bf16.mxu0 %v1450_v0  ;;  %v1452_v2 = vld [vmem:[#allocation7 + $0x10] sm:$0xff]   ;;  %v1453_v3 = vld [vmem:[#allocation7 + $0x18] sm:$0xff]   ;;  %v1458_v4 = vld [vmem:[#allocation2] sm:$0xff]   ;;  %s1145_s10 = sshll.u32 %s1791_s8, 4  ;;  %s1146_s10 = int_to_ptr.vmem [resolvable:$true] %s1145_s10 }
  0xa1   :  { %1297 = vmatpush3.bf16.msra.mxu0 %v1450_v0  ;;  %v1454_v5 = vld [vmem:[#allocation7 + $0x20] sm:$0xff]   ;;  %1312 = vmatprep.mubr.bf16.mxu0 %v1458_v4  ;;  %v1455_v6 = vld [vmem:[#allocation7 + $0x28] sm:$0xff]   ;;  %v1456_v7 = vld [vmem:[#allocation7 + $0x30] sm:$0xff]   ;;  %s1746_s12 = scalar_lea.vmem %s1146_s10, 512  ;;  %p1751_p3 = scmp.lt.s32.totalorder %s1146_s10, %s1146_s10 }
  0xa2   :  { %1298 = vmatprep.subr.bf16.mxu0 %v1451_v1  ;;  %v1457_v8 = vld [vmem:[#allocation7 + $0x38] sm:$0xff]   ;;  %v1459_v9 = vld [vmem:[#allocation2 + $0x8] sm:$0xff]   ;;  %v1460_v23 = vld [vmem:[#allocation8] sm:$0xff]   ;;  %p1747_p2 = scmp.ne.s32.totalorder %s1146_s10, %s1746_s12  ;;  %p1752_p4 = scmp.lt.s32.totalorder %s1746_s12, %s1746_s12 }
  0xa3   :  { %v1161_v10 = vld [vmem:[#allocation5] ss:$0 sm:$0xff]  ;;  %1316 = vmatprep.subr.bf16.mxu1 %v1460_v23  ;;  %v1461_v24 = vld [vmem:[#allocation8 + $0x8] sm:$0xff]   ;;  %v1462_v25 = vld [vmem:[#allocation8 + $0x10] sm:$0xff]  }
  0xa4   :  { %1317 = vmatpush3.bf16.msra.mxu1 %v1460_v23  ;;  %v1463_v26 = vld [vmem:[#allocation8 + $0x18] sm:$0xff]   ;;  %v1464_v27 = vld [vmem:[#allocation8 + $0x20] sm:$0xff]   ;;  %v1465_v28 = vld [vmem:[#allocation8 + $0x28] sm:$0xff]   ;;  %p1753_p5 = por %p1752_p4, %p1751_p3 }
  0xa5   :  { %1299 = vmatpush3.bf16.msra.mxu0 %v1451_v1  ;;  %1318 = vmatprep.subr.bf16.mxu1 %v1461_v24  ;;  %v1466_v29 = vld [vmem:[#allocation8 + $0x30] sm:$0xff]   ;;  %v1467_v30 = vld [vmem:[#allocation8 + $0x38] sm:$0xff]   ;;  %v1468_v31 = vld [vmem:[#allocation10] sm:$0xff]  }
  0xa6   :  { %1300 = vmatprep.subr.bf16.mxu0 %v1452_v2  ;;  %v1469_v32 = vld [vmem:[#allocation10 + $0x8] sm:$0xff]   ;;  %p1754_p6 = pnand %p1753_p5, %p1747_p2 }
  0xa8   :  { %1319 = vmatpush3.bf16.msra.mxu1 %v1461_v24 }
  0xa9   :  { %1301 = vmatpush3.bf16.msra.mxu0 %v1452_v2  ;;  %1320 = vmatprep.subr.bf16.mxu1 %v1462_v25 }
  0xaa   :  { %1302 = vmatprep.subr.bf16.mxu0 %v1453_v3 }
  0xac   :  { %1321 = vmatpush3.bf16.msra.mxu1 %v1462_v25 }
  0xad   :  { %1303 = vmatpush3.bf16.msra.mxu0 %v1453_v3  ;;  %1322 = vmatprep.subr.bf16.mxu1 %v1463_v26 }
  0xae   :  { %1304 = vmatprep.subr.bf16.mxu0 %v1454_v5 }
  0xb0   :  { %1323 = vmatpush3.bf16.msra.mxu1 %v1463_v26 }
  0xb1   :  { %1305 = vmatpush3.bf16.msra.mxu0 %v1454_v5  ;;  %1324 = vmatprep.subr.bf16.mxu1 %v1464_v27 }
  0xb2   :  { %1306 = vmatprep.subr.bf16.mxu0 %v1455_v6 }
  0xb4   :  { %1325 = vmatpush3.bf16.msra.mxu1 %v1464_v27 }
  0xb5   :  { %1307 = vmatpush3.bf16.msra.mxu0 %v1455_v6  ;;  %1326 = vmatprep.subr.bf16.mxu1 %v1465_v28 }
  0xb6   :  { %1308 = vmatprep.subr.bf16.mxu0 %v1456_v7 }
  0xb8   :  { %1327 = vmatpush3.bf16.msra.mxu1 %v1465_v28 }
  0xb9   :  { %1309 = vmatpush3.bf16.msra.mxu0 %v1456_v7  ;;  %1328 = vmatprep.subr.bf16.mxu1 %v1466_v29 }
  0xba   :  { %1310 = vmatprep.subr.bf16.mxu0 %v1457_v8 }
  0xbc   :  { %1329 = vmatpush3.bf16.msra.mxu1 %v1466_v29 }
  0xbd   :  { %1311 = vmatpush3.bf16.msra.mxu0 %v1457_v8  ;;  %1330 = vmatprep.subr.bf16.mxu1 %v1467_v30 }
  0xbe   :  { %1336 = vmatprep.subr.bf16.mxu0 %v1468_v31 }
  0xc0   :  { %1313 = vmatmul.mubr.bf16.vlgmr.msra.gmra.mrb[0].mxu0 %v1459_v9  ;;  %1331 = vmatpush3.bf16.msra.mxu1 %v1467_v30 }
  0xc1   :  { %1337 = vmatpush3.bf16.msra.mxu0 %v1468_v31  ;;  %v1470_v31 = vld [vmem:[#allocation10 + $0x10] sm:$0xff]  }
  0xc2   :  { %1338 = vmatprep.subr.bf16.mxu0 %v1469_v32 }
  0xc5   :  { %1339 = vmatpush3.bf16.msra.mxu0 %v1469_v32  ;;  %v1471_v32 = vld [vmem:[#allocation10 + $0x18] sm:$0xff]  }
  0xc6   :  { %1340 = vmatprep.subr.bf16.mxu0 %v1470_v31 }
  0xc9   :  { %1341 = vmatpush3.bf16.msra.mxu0 %v1470_v31  ;;  %v1488_v31 = vld [vmem:[#allocation13 + $0x20] sm:$0xff]  }
  0xca   :  { %1342 = vmatprep.subr.bf16.mxu0 %v1471_v32 }
  0xcd   :  { %1343 = vmatpush3.bf16.msra.mxu0 %v1471_v32  ;;  %v1493_v32 = vld [vmem:[#allocation14 + $0x8] sm:$0xff]  }
 0x193   :  { %v1314_v11 = vpop.f32.mrb[0].mxu0 }
 0x194   :  { %v1976_v12 = vadd.f32 %v1314_v11, %v1161_v10  ;;  %v273_v13 = vpop.f32.mrb[1].mxu0 }
 0x195   :  { %v1978_v14 = vadd.f32 %v1161_v10, %v273_v13  ;;  %v1315_v15 = vpop.f32.mrb[2].mxu0 }
 0x196   :  { %292 = vadd.xlane.f32.xlu1 %v1976_v12  ;;  %v276_v16 = vpop.f32.mrb[3].mxu0  ;;  %v1982_v17 = vadd.f32 %v1315_v15, %v1161_v10  ;;  %v302_v22 = vmul.f32 %v1976_v12, %v1976_v12 }
 0x197   :  { %288 = vadd.xlane.f32.xlu0 %v1978_v14  ;;  %v1984_v18 = vadd.f32 %v1161_v10, %v276_v16  ;;  %v300_v20 = vmul.f32 %v1978_v14, %v1978_v14 }
 0x198   :  { %v303_v21 = vmul.f32 %v1982_v17, %v1982_v17 }
 0x199   :  { %v301_v19 = vmul.f32 %v1984_v18, %v1984_v18 }
 0x19a   :  { %294 = vadd.xlane.f32.xlu1 %v1982_v17 }
 0x19b   :  { %290 = vadd.xlane.f32.xlu0 %v1984_v18 }
 0x19e   :  { %306 = vadd.xlane.f32.xlu1 %v301_v19 }
 0x19f   :  { %304 = vadd.xlane.f32.xlu0 %v300_v20 }
 0x1a2   :  { %310 = vadd.xlane.f32.xlu1 %v303_v21 }
 0x1a3   :  { %308 = vadd.xlane.f32.xlu0 %v302_v22 }
 0x223   :  { %v293_v33 = vpop.xlane.xlu1 %292 }
 0x224   :  { %v289_v34 = vpop.xlane.xlu0 %288  ;;  %v298_v44 = vmul.f32 0.03125, %v293_v33  ;;  %v1472_v33 = vld [vmem:[#allocation10 + $0x20] sm:$0xff]  }
 0x225   :  { %v296_v37 = vmul.f32 0.03125, %v289_v34  ;;  %1344 = vmatprep.subr.bf16.mxu0 %v1472_v33  ;;  %v1473_v34 = vld [vmem:[#allocation10 + $0x28] sm:$0xff]  }
 0x226   :  { %v318_v54 = vmul.f32 %v298_v44, %v298_v44  ;;  %v330_v10 = vsub.f32 %v1976_v12, %v298_v44  ;;  %1345 = vmatpush3.bf16.msra.mxu0 %v1472_v33  ;;  %v1190_v33 = vld [vmem:[#allocation5 + $0x3] ss:$0 sm:$0xff] }
 0x227   :  { %v295_v35 = vpop.xlane.xlu1 %294  ;;  %v316_v45 = vmul.f32 %v296_v37, %v296_v37  ;;  %v328_v3 = vsub.f32 %v1978_v14, %v296_v37  ;;  %1346 = vmatprep.subr.bf16.mxu0 %v1473_v34  ;;  %v1476_v37 = vld [vmem:[#allocation11] sm:$0xff]  }
 0x228   :  { %v291_v36 = vpop.xlane.xlu0 %290  ;;  %v299_v41 = vmul.f32 0.03125, %v295_v35  ;;  %v1474_v35 = vld [vmem:[#allocation10 + $0x30] sm:$0xff]   ;;  %1356 = vmatprep.subr.bf16.mxu1 %v1476_v37 }
 0x229   :  { %v297_v38 = vmul.f32 0.03125, %v291_v36  ;;  %v1475_v36 = vld [vmem:[#allocation10 + $0x38] sm:$0xff]  }
 0x22a   :  { %v319_v50 = vmul.f32 %v299_v41, %v299_v41  ;;  %v331_v7 = vsub.f32 %v1982_v17, %v299_v41  ;;  %1347 = vmatpush3.bf16.msra.mxu0 %v1473_v34  ;;  %v1480_v41 = vld [vmem:[#allocation11 + $0x20] sm:$0xff]  }
 0x22b   :  { %v317_v39 = vmul.f32 %v297_v38, %v297_v38  ;;  %v307_v40 = vpop.xlane.xlu1 %306  ;;  %v329_v1 = vsub.f32 %v1984_v18, %v297_v38  ;;  %1348 = vmatprep.subr.bf16.mxu0 %v1474_v35  ;;  %v1477_v38 = vld [vmem:[#allocation11 + $0x8] sm:$0xff]  }
 0x22c   :  { %v313_v42 = vmul.f32 0.03125, %v307_v40  ;;  %v305_v43 = vpop.xlane.xlu0 %304  ;;  %v1479_v40 = vld [vmem:[#allocation11 + $0x18] sm:$0xff]  }
 0x22d   :  { %v312_v46 = vmul.f32 0.03125, %v305_v43  ;;  %v1172_v43 = vld [vmem:[#allocation5 + $0x1] ss:$0 sm:$0xff] }
 0x22e   :  { %v321_v47 = vsub.f32 %v313_v42, %v317_v39  ;;  %1349 = vmatpush3.bf16.msra.mxu0 %v1474_v35  ;;  %v1478_v39 = vld [vmem:[#allocation11 + $0x10] sm:$0xff]   ;;  %v1481_v42 = vld [vmem:[#allocation11 + $0x28] sm:$0xff]  }
 0x22f   :  { %v320_v48 = vsub.f32 %v312_v46, %v316_v45  ;;  %v311_v49 = vpop.xlane.xlu1 %310  ;;  %1350 = vmatprep.subr.bf16.mxu0 %v1475_v36 }
 0x230   :  { %v325_v51 = vmax.f32 %v321_v47, 0.0  ;;  %v315_v52 = vmul.f32 0.03125, %v311_v49  ;;  %v309_v53 = vpop.xlane.xlu0 %308 }
 0x231   :  { %v324_v55 = vmax.f32 %v320_v48, 0.0  ;;  %v314_v56 = vmul.f32 0.03125, %v309_v53 }
 0x232   :  { %v333_v57 = vadd.f32 1e-05, %v325_v51  ;;  %v323_v58 = vsub.f32 %v315_v52, %v319_v50  ;;  %1351 = vmatpush3.bf16.msra.mxu0 %v1475_v36 }
 0x233   :  { %v332_v59 = vadd.f32 1e-05, %v324_v55  ;;  %v322_v60 = vsub.f32 %v314_v56, %v318_v54 }
 0x234   :  { %1508 = vrsqrt.f32 %v333_v57  ;;  %v327_v61 = vmax.f32 %v323_v58, 0.0 }
 0x235   :  { %1510 = vrsqrt.f32 %v332_v59  ;;  %v326_v62 = vmax.f32 %v322_v60, 0.0 }
 0x236   :  { %v335_v63 = vadd.f32 1e-05, %v327_v61 }
 0x237   :  { %v334_v0 = vadd.f32 1e-05, %v326_v62 }
 0x238   :  { %1512 = vrsqrt.f32 %v335_v63 }
 0x239   :  { %1514 = vrsqrt.f32 %v334_v0 }
 0x23e   :  { %v1509_v2 = vpop.eup %1508 }
 0x23f   :  { %v1511_v4 = vpop.eup %1510  ;;  %v341_v5 = vmul.f32 %v1509_v2, %v329_v1 }
 0x240   :  { %v340_v6 = vmul.f32 %v1511_v4, %v328_v3 }
 0x241   :  { %v345_v8 = vmul.f32 0.5, %v341_v5 }
 0x242   :  { %v1513_v9 = vpop.eup %1512  ;;  %v344_v11 = vmul.f32 0.5, %v340_v6  ;;  %v1482_v6 = vld [vmem:[#allocation11 + $0x30] sm:$0xff]  }
 0x243   :  { %v1515_v13 = vpop.eup %1514  ;;  %1516 = vtanh.f32 %v345_v8  ;;  %v343_v15 = vmul.f32 %v1513_v9, %v331_v7  ;;  %v1483_v7 = vld [vmem:[#allocation11 + $0x38] sm:$0xff]   ;;  %v1485_v9 = vld [vmem:[#allocation13 + $0x8] sm:$0xff]  }
 0x244   :  { %1518 = vtanh.f32 %v344_v11  ;;  %v342_v16 = vmul.f32 %v1515_v13, %v330_v10  ;;  %v1181_v10 = vld [vmem:[#allocation5 + $0x2] ss:$0 sm:$0xff] }
 0x245   :  { %v347_v19 = vmul.f32 0.5, %v343_v15 }
 0x246   :  { %v346_v18 = vmul.f32 0.5, %v342_v16 }
 0x247   :  { %1520 = vtanh.f32 %v347_v19 }
 0x248   :  { %1522 = vtanh.f32 %v346_v18 }
 0x24d   :  { %v1517_v14 = vpop.eup %1516 }
 0x24e   :  { %v1519_v20 = vpop.eup %1518  ;;  %v353_v21 = vadd.f32 1.0, %v1517_v14 }
 0x24f   :  { %v352_v22 = vadd.f32 1.0, %v1519_v20 }
 0x250   :  { %v2000_v23 = vmul.f32 %v353_v21, %v345_v8  ;;  %v1484_v8 = vld [vmem:[#allocation13] sm:$0xff]  }
 0x251   :  { %v1521_v17 = vpop.eup %1520  ;;  %v2002_v24 = vmul.f32 %v352_v22, %v344_v11  ;;  %1376 = vmatprep.subr.bf16.mxu0 %v1484_v8 }
 0x252   :  { %v1523_v12 = vpop.eup %1522  ;;  %v355_v25 = vadd.f32 1.0, %v1521_v17 }
 0x253   :  { %v392_v26 = vpack.c.bf16 %v2000_v23, %v2002_v24  ;;  %v354_v27 = vadd.f32 1.0, %v1523_v12 }
 0x254   :  { %v2006_v28 = vmul.f32 %v355_v25, %v347_v19 }
 0x255   :  { %1332 = vmatprep.mubr.bf16.mxu1 %v392_v26  ;;  %v2008_v29 = vmul.f32 %v354_v27, %v346_v18  ;;  %v1486_v27 = vld [vmem:[#allocation13 + $0x10] sm:$0xff]  }
 0x257   :  { %v393_v30 = vpack.c.bf16 %v2006_v28, %v2008_v29 }
 0x259   :  { %1333 = vmatmul.mubr.bf16.vlgmr.msra.gmra.mrb[0].mxu1 %v393_v30  ;;  %v1487_v30 = vld [vmem:[#allocation13 + $0x18] sm:$0xff]  }
 0x25a   :  { %1357 = vmatpush3.bf16.msra.mxu1 %v1476_v37 }
 0x25b   :  { %1358 = vmatprep.subr.bf16.mxu1 %v1477_v38 }
 0x25e   :  { %1359 = vmatpush3.bf16.msra.mxu1 %v1477_v38 }
 0x25f   :  { %1360 = vmatprep.subr.bf16.mxu1 %v1478_v39 }
 0x262   :  { %1361 = vmatpush3.bf16.msra.mxu1 %v1478_v39 }
 0x263   :  { %1362 = vmatprep.subr.bf16.mxu1 %v1479_v40 }
 0x266   :  { %1363 = vmatpush3.bf16.msra.mxu1 %v1479_v40 }
 0x267   :  { %1364 = vmatprep.subr.bf16.mxu1 %v1480_v41 }
 0x26a   :  { %1365 = vmatpush3.bf16.msra.mxu1 %v1480_v41 }
 0x26b   :  { %1366 = vmatprep.subr.bf16.mxu1 %v1481_v42 }
 0x26e   :  { %1367 = vmatpush3.bf16.msra.mxu1 %v1481_v42 }
 0x26f   :  { %1368 = vmatprep.subr.bf16.mxu1 %v1482_v6 }
 0x272   :  { %1369 = vmatpush3.bf16.msra.mxu1 %v1482_v6  ;;  %v1504_v6 = vld [vmem:[#allocation16 + $0x20] sm:$0xff]  }
 0x273   :  { %1370 = vmatprep.subr.bf16.mxu1 %v1483_v7 }
 0x276   :  { %1371 = vmatpush3.bf16.msra.mxu1 %v1483_v7  ;;  %v1505_v7 = vld [vmem:[#allocation16 + $0x28] sm:$0xff]  }
 0x32c   :  { %v1334_v44 = vpop.f32.mrb[0].mxu1 }
 0x32d   :  { %v490_v45 = vadd.f32 %v1334_v44, %v1172_v43  ;;  %v481_v46 = vpop.f32.mrb[1].mxu1 }
 0x32e   :  { %v482_v47 = vadd.f32 %v1172_v43, %v481_v46  ;;  %v1335_v48 = vpop.f32.mrb[2].mxu1 }
 0x32f   :  { %v498_v49 = vmul.f32 0.5, %v490_v45  ;;  %v493_v50 = vadd.f32 %v1335_v48, %v1172_v43  ;;  %v484_v51 = vpop.f32.mrb[3].mxu1 }
 0x330   :  { %v496_v52 = vmul.f32 0.5, %v482_v47  ;;  %v485_v53 = vadd.f32 %v1172_v43, %v484_v51 }
 0x331   :  { %1524 = vtanh.f32 %v498_v49  ;;  %v499_v54 = vmul.f32 0.5, %v493_v50 }
 0x332   :  { %1526 = vtanh.f32 %v496_v52  ;;  %v497_v55 = vmul.f32 0.5, %v485_v53 }
 0x333   :  { %1528 = vtanh.f32 %v499_v54 }
 0x334   :  { %1530 = vtanh.f32 %v497_v55 }
 0x33b   :  { %v1525_v56 = vpop.eup %1524 }
 0x33c   :  { %v1527_v57 = vpop.eup %1526  ;;  %v506_v58 = vadd.f32 1.0, %v1525_v56 }
 0x33d   :  { %v1529_v59 = vpop.eup %1528  ;;  %v504_v60 = vadd.f32 1.0, %v1527_v57 }
 0x33e   :  { %v1531_v61 = vpop.eup %1530  ;;  %v507_v62 = vadd.f32 1.0, %v1529_v59  ;;  %v510_v0 = vmul.f32 %v506_v58, %v498_v49 }
 0x33f   :  { %v505_v63 = vadd.f32 1.0, %v1531_v61  ;;  %v508_v2 = vmul.f32 %v504_v60, %v496_v52  ;;  %v1494_v60 = vld [vmem:[#allocation14 + $0x10] sm:$0xff]   ;;  %v1495_v61 = vld [vmem:[#allocation14 + $0x18] sm:$0xff]  }
 0x340   :  { %v511_v1 = vmul.f32 %v507_v62, %v499_v54  ;;  %v1496_v62 = vld [vmem:[#allocation14 + $0x20] sm:$0xff]  }
 0x341   :  { %v509_v3 = vmul.f32 %v505_v63, %v497_v55  ;;  %v1497_v63 = vld [vmem:[#allocation14 + $0x28] sm:$0xff]  }
 0x342   :  { %v513_v4 = vpack.c.bf16 %v511_v1, %v510_v0  ;;  %v1498_v0 = vld [vmem:[#allocation14 + $0x30] sm:$0xff]   ;;  %v1499_v1 = vld [vmem:[#allocation14 + $0x38] sm:$0xff]  }
 0x343   :  { %v512_v5 = vpack.c.bf16 %v509_v3, %v508_v2  ;;  %v1500_v2 = vld [vmem:[#allocation16] sm:$0xff]   ;;  %v1501_v3 = vld [vmem:[#allocation16 + $0x8] sm:$0xff]  }
 0x345   :  { %1352 = vmatprep.mubr.bf16.mxu0 %v512_v5  ;;  %v1503_v5 = vld [vmem:[#allocation16 + $0x18] sm:$0xff]  }
 0x346   :  { %1353 = vmatmul.mubr.bf16.vlgmr.msra.gmra.mrb[4].mxu0 %v513_v4  ;;  %v1502_v4 = vld [vmem:[#allocation16 + $0x10] sm:$0xff]  }
 0x347   :  { %1377 = vmatpush3.bf16.msra.mxu0 %v1484_v8  ;;  %v1199_v8 = vld [vmem:[#allocation5 + $0x4] ss:$0 sm:$0xff] }
 0x348   :  { %1378 = vmatprep.subr.bf16.mxu0 %v1485_v9 }
 0x34b   :  { %1379 = vmatpush3.bf16.msra.mxu0 %v1485_v9 }
 0x34c   :  { %1380 = vmatprep.subr.bf16.mxu0 %v1486_v27 }
 0x34f   :  { %1381 = vmatpush3.bf16.msra.mxu0 %v1486_v27 }
 0x350   :  { %1382 = vmatprep.subr.bf16.mxu0 %v1487_v30 }
 0x353   :  { %1383 = vmatpush3.bf16.msra.mxu0 %v1487_v30 }
 0x354   :  { %1384 = vmatprep.subr.bf16.mxu0 %v1488_v31 }
 0x357   :  { %1385 = vmatpush3.bf16.msra.mxu0 %v1488_v31 }
 0x419   :  { %v1354_v11 = vpop.f32.mrb[4].mxu0 }
 0x41a   :  { %v610_v13 = vadd.f32 %v1354_v11, %v1181_v10  ;;  %v601_v15 = vpop.f32.mrb[5].mxu0 }
 0x41b   :  { %v602_v16 = vadd.f32 %v1181_v10, %v601_v15  ;;  %v1355_v19 = vpop.f32.mrb[6].mxu0 }
 0x41c   :  { %v613_v18 = vadd.f32 %v1355_v19, %v1181_v10  ;;  %v604_v14 = vpop.f32.mrb[7].mxu0  ;;  %v618_v21 = vadd.f32 %v610_v13, %v2008_v29  ;;  %v1489_v29 = vld [vmem:[#allocation13 + $0x28] sm:$0xff]  }
 0x41d   :  { %v605_v20 = vadd.f32 %v1181_v10, %v604_v14  ;;  %v616_v17 = vadd.f32 %v602_v16, %v2002_v24  ;;  %1386 = vmatprep.subr.bf16.mxu0 %v1489_v29  ;;  %v1492_v24 = vld [vmem:[#allocation14] sm:$0xff]  }
 0x41e   :  { %v619_v22 = vadd.f32 %v613_v18, %v2006_v28  ;;  %1387 = vmatpush3.bf16.msra.mxu0 %v1489_v29  ;;  %v1490_v28 = vld [vmem:[#allocation13 + $0x30] sm:$0xff]   ;;  %1396 = vmatprep.subr.bf16.mxu1 %v1492_v24 }
 0x41f   :  { %v617_v12 = vadd.f32 %v605_v20, %v2000_v23  ;;  %1388 = vmatprep.subr.bf16.mxu0 %v1490_v28  ;;  %v1491_v23 = vld [vmem:[#allocation13 + $0x38] sm:$0xff]  }
 0x420   :  { %v637_v25 = vpack.c.bf16 %v619_v22, %v618_v21 }
 0x421   :  { %v636_v26 = vpack.c.bf16 %v617_v12, %v616_v17 }
 0x422   :  { %1389 = vmatpush3.bf16.msra.mxu0 %v1490_v28 }
 0x423   :  { %1372 = vmatprep.mubr.bf16.mxu1 %v636_v26  ;;  %1390 = vmatprep.subr.bf16.mxu0 %v1491_v23 }
 0x424   :  { %1373 = vmatmul.mubr.bf16.vlgmr.msra.gmra.mrb[4].mxu1 %v637_v25 }
 0x425   :  { %1397 = vmatpush3.bf16.msra.mxu1 %v1492_v24 }
 0x426   :  { %1391 = vmatpush3.bf16.msra.mxu0 %v1491_v23  ;;  %1398 = vmatprep.subr.bf16.mxu1 %v1493_v32 }
 0x427   :  { %1416 = vmatprep.subr.bf16.mxu0 %v1500_v2 }
 0x429   :  { %1399 = vmatpush3.bf16.msra.mxu1 %v1493_v32 }
 0x42a   :  { %1400 = vmatprep.subr.bf16.mxu1 %v1494_v60 }
 0x42d   :  { %1401 = vmatpush3.bf16.msra.mxu1 %v1494_v60 }
 0x42e   :  { %1402 = vmatprep.subr.bf16.mxu1 %v1495_v61 }
 0x431   :  { %1403 = vmatpush3.bf16.msra.mxu1 %v1495_v61 }
 0x432   :  { %1404 = vmatprep.subr.bf16.mxu1 %v1496_v62 }
 0x435   :  { %1405 = vmatpush3.bf16.msra.mxu1 %v1496_v62 }
 0x436   :  { %1406 = vmatprep.subr.bf16.mxu1 %v1497_v63 }
 0x439   :  { %1407 = vmatpush3.bf16.msra.mxu1 %v1497_v63 }
 0x43a   :  { %1408 = vmatprep.subr.bf16.mxu1 %v1498_v0 }
 0x43d   :  { %1409 = vmatpush3.bf16.msra.mxu1 %v1498_v0 }
 0x43e   :  { %1410 = vmatprep.subr.bf16.mxu1 %v1499_v1 }
 0x441   :  { %1411 = vmatpush3.bf16.msra.mxu1 %v1499_v1 }
 0x4f7   :  { %v1374_v34 = vpop.f32.mrb[4].mxu1 }
 0x4f8   :  { %v734_v35 = vadd.f32 %v1374_v34, %v1190_v33  ;;  %v725_v36 = vpop.f32.mrb[5].mxu1 }
 0x4f9   :  { %v726_v37 = vadd.f32 %v1190_v33, %v725_v36  ;;  %v1375_v38 = vpop.f32.mrb[6].mxu1  ;;  %v1507_v36 = vld [vmem:[#allocation16 + $0x38] sm:$0xff]  }
 0x4fa   :  { %v742_v39 = vmul.f32 0.5, %v734_v35  ;;  %v737_v40 = vadd.f32 %v1375_v38, %v1190_v33  ;;  %v728_v41 = vpop.f32.mrb[7].mxu1  ;;  %v1506_v35 = vld [vmem:[#allocation16 + $0x30] sm:$0xff]  }
 0x4fb   :  { %v740_v42 = vmul.f32 0.5, %v726_v37  ;;  %v729_v43 = vadd.f32 %v1190_v33, %v728_v41  ;;  %v1208_v37 = vld [vmem:[#allocation5 + $0x5] ss:$0 sm:$0xff] }
 0x4fc   :  { %1532 = vtanh.f32 %v742_v39  ;;  %v743_v44 = vmul.f32 0.5, %v737_v40 }
 0x4fd   :  { %1534 = vtanh.f32 %v740_v42  ;;  %v741_v45 = vmul.f32 0.5, %v729_v43 }
 0x4fe   :  { %1536 = vtanh.f32 %v743_v44 }
 0x4ff   :  { %1538 = vtanh.f32 %v741_v45 }
 0x506   :  { %v1533_v46 = vpop.eup %1532 }
 0x507   :  { %v1535_v47 = vpop.eup %1534  ;;  %v750_v51 = vadd.f32 1.0, %v1533_v46 }
 0x508   :  { %v1537_v48 = vpop.eup %1536  ;;  %v748_v49 = vadd.f32 1.0, %v1535_v47 }
 0x509   :  { %v1539_v50 = vpop.eup %1538  ;;  %v751_v52 = vadd.f32 1.0, %v1537_v48  ;;  %v2022_v57 = vmul.f32 %v750_v51, %v742_v39 }
 0x50a   :  { %v749_v53 = vadd.f32 1.0, %v1539_v50  ;;  %v2018_v55 = vmul.f32 %v748_v49, %v740_v42 }
 0x50b   :  { %v2016_v54 = vmul.f32 %v751_v52, %v743_v44  ;;  %v1217_v52 = vld [vmem:[#allocation5 + $0x6] ss:$0 sm:$0xff] }
 0x50c   :  { %v2020_v56 = vmul.f32 %v749_v53, %v741_v45 }
 0x50d   :  { %v789_v59 = vpack.c.bf16 %v2016_v54, %v2022_v57 }
 0x50e   :  { %v788_v58 = vpack.c.bf16 %v2020_v56, %v2018_v55 }
 0x510   :  { %1392 = vmatprep.mubr.bf16.mxu0 %v788_v58 }
 0x511   :  { %1393 = vmatmul.mubr.bf16.vlgmr.msra.gmra.mrb[8].mxu0 %v789_v59 }
 0x512   :  { %1417 = vmatpush3.bf16.msra.mxu0 %v1500_v2 }
 0x513   :  { %1418 = vmatprep.subr.bf16.mxu0 %v1501_v3 }
 0x516   :  { %1419 = vmatpush3.bf16.msra.mxu0 %v1501_v3 }
 0x517   :  { %1420 = vmatprep.subr.bf16.mxu0 %v1502_v4 }
 0x51a   :  { %1421 = vmatpush3.bf16.msra.mxu0 %v1502_v4 }
 0x51b   :  { %1422 = vmatprep.subr.bf16.mxu0 %v1503_v5 }
 0x51e   :  { %1423 = vmatpush3.bf16.msra.mxu0 %v1503_v5 }
 0x51f   :  { %1424 = vmatprep.subr.bf16.mxu0 %v1504_v6 }
 0x522   :  { %1425 = vmatpush3.bf16.msra.mxu0 %v1504_v6 }
 0x523   :  { %1426 = vmatprep.subr.bf16.mxu0 %v1505_v7 }
 0x526   :  { %1427 = vmatpush3.bf16.msra.mxu0 %v1505_v7 }
 0x527   :  { %1428 = vmatprep.subr.bf16.mxu0 %v1506_v35 }
 0x52a   :  { %1429 = vmatpush3.bf16.msra.mxu0 %v1506_v35 }
 0x52b   :  { %1430 = vmatprep.subr.bf16.mxu0 %v1507_v36 }
 0x52e   :  { %1431 = vmatpush3.bf16.msra.mxu0 %v1507_v36 }
 0x5e4   :  { %v1394_v9 = vpop.f32.mrb[8].mxu0 }
 0x5e5   :  { %v886_v10 = vadd.f32 %v1394_v9, %v1199_v8  ;;  %v877_v11 = vpop.f32.mrb[9].mxu0 }
 0x5e6   :  { %v878_v13 = vadd.f32 %v1199_v8, %v877_v11  ;;  %v1395_v15 = vpop.f32.mrb[10].mxu0 }
 0x5e7   :  { %v894_v16 = vmul.f32 0.5, %v886_v10  ;;  %v889_v19 = vadd.f32 %v1395_v15, %v1199_v8  ;;  %v880_v18 = vpop.f32.mrb[11].mxu0 }
 0x5e8   :  { %v892_v14 = vmul.f32 0.5, %v878_v13  ;;  %v881_v20 = vadd.f32 %v1199_v8, %v880_v18 }
 0x5e9   :  { %1540 = vtanh.f32 %v894_v16  ;;  %v895_v21 = vmul.f32 0.5, %v889_v19 }
 0x5ea   :  { %1542 = vtanh.f32 %v892_v14  ;;  %v893_v22 = vmul.f32 0.5, %v881_v20 }
 0x5eb   :  { %1544 = vtanh.f32 %v895_v21 }
 0x5ec   :  { %1546 = vtanh.f32 %v893_v22 }
 0x5f3   :  { %v1541_v17 = vpop.eup %1540 }
 0x5f4   :  { %v1543_v12 = vpop.eup %1542  ;;  %v902_v25 = vadd.f32 1.0, %v1541_v17 }
 0x5f5   :  { %v1545_v26 = vpop.eup %1544  ;;  %v900_v27 = vadd.f32 1.0, %v1543_v12 }
 0x5f6   :  { %v1547_v30 = vpop.eup %1546  ;;  %v903_v31 = vadd.f32 1.0, %v1545_v26  ;;  %v906_v28 = vmul.f32 %v902_v25, %v894_v16 }
 0x5f7   :  { %v901_v29 = vadd.f32 1.0, %v1547_v30  ;;  %v904_v24 = vmul.f32 %v900_v27, %v892_v14 }
 0x5f8   :  { %v907_v23 = vmul.f32 %v903_v31, %v895_v21 }
 0x5f9   :  { %v905_v32 = vmul.f32 %v901_v29, %v893_v22 }
 0x5fa   :  { %v909_v33 = vpack.c.bf16 %v907_v23, %v906_v28 }
 0x5fb   :  { %v908_v34 = vpack.c.bf16 %v905_v32, %v904_v24 }
 0x5fd   :  { %1412 = vmatprep.mubr.bf16.mxu1 %v908_v34 }
 0x5fe   :  { %1413 = vmatmul.mubr.bf16.vlgmr.msra.gmra.mrb[8].mxu1 %v909_v33 }
 0x6d1   :  { %v1414_v38 = vpop.f32.mrb[8].mxu1 }
 0x6d2   :  { %v1006_v39 = vadd.f32 %v1414_v38, %v1208_v37  ;;  %v997_v40 = vpop.f32.mrb[9].mxu1 }
 0x6d3   :  { %v998_v41 = vadd.f32 %v1208_v37, %v997_v40  ;;  %v1415_v42 = vpop.f32.mrb[10].mxu1 }
 0x6d4   :  { %v1009_v43 = vadd.f32 %v1415_v42, %v1208_v37  ;;  %v1000_v44 = vpop.f32.mrb[11].mxu1  ;;  %v1014_v46 = vadd.f32 %v1006_v39, %v2022_v57 }
 0x6d5   :  { %v1001_v45 = vadd.f32 %v1208_v37, %v1000_v44  ;;  %v1012_v48 = vadd.f32 %v998_v41, %v2018_v55 }
 0x6d6   :  { %v1015_v47 = vadd.f32 %v1009_v43, %v2016_v54 }
 0x6d7   :  { %v1013_v49 = vadd.f32 %v1001_v45, %v2020_v56 }
 0x6d8   :  { %v1033_v50 = vpack.c.bf16 %v1015_v47, %v1014_v46 }
 0x6d9   :  { %v1032_v51 = vpack.c.bf16 %v1013_v49, %v1012_v48 }
 0x6db   :  { %1432 = vmatprep.mubr.bf16.mxu0 %v1032_v51 }
 0x6dc   :  { %1433 = vmatmul.mubr.bf16.vlgmr.msra.gmra.mrb[12].mxu0 %v1033_v50 }
 0x7af   :  { %v1434_v53 = vpop.f32.mrb[12].mxu0 }
 0x7b0   :  { %v1130_v58 = vadd.f32 %v1434_v53, %v1217_v52  ;;  %v1121_v59 = vpop.f32.mrb[13].mxu0 }
 0x7b1   :  { %v1122_v60 = vadd.f32 %v1217_v52, %v1121_v59  ;;  %v1435_v61 = vpop.f32.mrb[14].mxu0 }
 0x7b2   :  { %1138 = vst [vmem:[#allocation17 + $0x10] sm:$0xff] %v1130_v58  ;;  %v1133_v57 = vadd.f32 %v1435_v61, %v1217_v52  ;;  %v1124_v62 = vpop.f32.mrb[15].mxu0 }
 0x7b3   :  { %1136 = vst [vmem:[#allocation17] sm:$0xff] %v1122_v60  ;;  %v1125_v54 = vadd.f32 %v1217_v52, %v1124_v62 }
 0x7b4   :  { %1139 = vst [vmem:[#allocation17 + $0x18] sm:$0xff] %v1133_v57 }
 0x7b5   :  { %1137 = vst [vmem:[#allocation17 + $0x8] sm:$0xff] %v1125_v54 }
 0x7b6   :  { %1757 = shalt.err (!%p1754_p6)
}
 0x7b7   :  { %s1758_s7 = scalar_lea.hbm %s2053_s9, 512 }
 0x7b8   :  { %p1759_p7 = scmp.ne.s32.totalorder %s2053_s9, %s1758_s7  ;;  %p1762_p8 = scmp.lt.u32.totalorder %s1758_s7, %s2053_s9 }
 0x7ba   :  { %p1764_p9 = pnand %p1762_p8, %p1759_p7 }
 0x7bc   :  { %1767 = shalt.err (!%p1764_p9)
}
 0x7bd   :  { %s1792_s11 = smov 128   ;;  %s1793_s1 = smov 8  }
 0x7be   :  { %1151 = dma.vmem_to_hbm [thread:$0]  %s1146_s10, 512, %s2053_s9, [#allocation4], %s1792_s11, %s1792_s11, %s1793_s1  }
 0x7bf   :  { %1778 = dma.done.wait [#allocation4], 512  }
 0x7c0   :  { %1779 = vsyncadd [#allocation4], 4294966784 }
 0x7c1   :  { %1155 = vsyncpa [#allocation3], 1 }
 0x7c2   :  { %1156 = vsyncpa [#allocation6], 1 }
 0x7c3   :  { %1157 = vsyncpa [#allocation9], 1 }
 0x7c4   :  { %1158 = vsyncpa [#allocation12], 1 }
 0x7c5   :  { %1159 = vsyncpa [#allocation15], 1 }
 0x7c6   :  { %1160 = vsyncpa [#allocation4], 1 }

</bundles_post_ra>
